<compile_context>
chip_gen: v7x
topology: tpu7x:2x2x1
jax: 0.10.0
libtpu: 0.0.40
codegen_flags: <defaults>
</compile_context>

<pallas_src>
import math

import jax
import jax.numpy as jnp
from jax.experimental import pallas as pl
from jax.experimental.pallas import tpu as pltpu


def _round_up(x, m):
    return (x + m - 1) // m * m


# -----------------------------------------------------------------------------
# Kernel: tiled conv-as-matmul (+ bias) with per-block channel sum / sumsq.
# grid = (M/tm, Np/tn, Kp/tk); K axis ("arbitrary") is innermost.
# -----------------------------------------------------------------------------
def conv_matmul_stats_kernel(a_ref, w_ref, b_ref, y_ref, sum_ref, sumsq_ref,
                             acc_ref):
    kk = pl.program_id(2)

    @pl.when(kk == 0)
    def _():
        acc_ref[...] = jnp.zeros_like(acc_ref)

    acc_ref[...] += jnp.dot(a_ref[...], w_ref[...],
                            preferred_element_type=jnp.float32)

    @pl.when(kk == pl.num_programs(2) - 1)
    def _():
        y = acc_ref[...] + b_ref[...]          # (tm, tn) + (1, tn) broadcast
        y_ref[...] = y.astype(y_ref.dtype)
        # Per-(i, j)-block partial stats -> reduced over the M-grid in JAX.
        sum_ref[...] = jnp.sum(y, axis=0).reshape(sum_ref.shape)
        sumsq_ref[...] = jnp.sum(y * y, axis=0).reshape(sumsq_ref.shape)


# -----------------------------------------------------------------------------
# im2col extraction (plain JAX, pure data movement / reshapes).
# Row order: (n, do, ho, wo); col order: (cin, kd, kh, kw).
# -----------------------------------------------------------------------------
def im2col_3d(x, k, stride, pad):
    N, C, D, H, W = x.shape
    xp = jnp.pad(x, ((0, 0), (0, 0), (pad, pad), (pad, pad), (pad, pad)))
    Do = (D + 2 * pad - k) // stride + 1
    Ho = (H + 2 * pad - k) // stride + 1
    Wo = (W + 2 * pad - k) // stride + 1
    cols = []
    for kd in range(k):
        for kh in range(k):
            for kw in range(k):
                cols.append(xp[:, :,
                                kd:kd + stride * Do:stride,
                                kh:kh + stride * Ho:stride,
                                kw:kw + stride * Wo:stride])
    cols = jnp.stack(cols, axis=0).reshape(k, k, k, N, C, Do, Ho, Wo)
    cols = jnp.transpose(cols, (3, 5, 6, 7, 4, 0, 1, 2))
    A = cols.reshape(N * Do * Ho * Wo, C * k * k * k)
    return A, (Do, Ho, Wo)


# -----------------------------------------------------------------------------
# Wrapper: conv_3d.forward(x) == BatchNorm3d(Conv3d(x))  (fresh module, train mode)
# -----------------------------------------------------------------------------
def conv3d_bn_forward(x, w, b, gamma, beta, stride, eps=1e-5, tm=512):
    N, Cin, D, H, W = x.shape
    Cout = w.shape[0]
    k = w.shape[2]
    pad = k // 2

    A, (Do, Ho, Wo) = im2col_3d(x, k, stride, pad)
    M, K = A.shape

    # ---- lane-dense / MXU-aligned padding ----------------------------------
    Np = _round_up(Cout, 128)                 # output channels -> lane dense
    Kp = _round_up(K, 128)                    # contraction    -> aligned
    tn = 128
    tk = 256 if Kp % 256 == 0 else 128
    tm = min(tm, _round_up(M, 8))             # big row tiles, multiple of 8
    Mp = _round_up(M, tm)
    Gm, Gn, Gk = Mp // tm, Np // tn, Kp // tk

    # bf16 operands for the MXU; accumulate in f32 inside the kernel.
    A_p = jnp.zeros((Mp, Kp), jnp.bfloat16).at[:M, :K].set(
        A.astype(jnp.bfloat16))
    Wm = jnp.zeros((Kp, Np), jnp.bfloat16).at[:K, :Cout].set(
        w.reshape(Cout, K).T.astype(jnp.bfloat16))
    bias_p = jnp.zeros((Np,), jnp.float32).at[:Cout].set(
        b.astype(jnp.float32))

    y_p, s_part, ss_part = pl.pallas_call(
        conv_matmul_stats_kernel,
        out_shape=(
            jax.ShapeDtypeStruct((Mp, Np), jnp.float32),
            jax.ShapeDtypeStruct((Gm, 1, Np), jnp.float32),
            jax.ShapeDtypeStruct((Gm, 1, Np), jnp.float32),
        ),
        grid_spec=pltpu.PrefetchScalarGridSpec(
            num_scalar_prefetch=0,
            grid=(Gm, Gn, Gk),
            in_specs=[
                pl.BlockSpec((tm, tk), lambda i, j, kk: (i, kk)),   # A
                pl.BlockSpec((tk, tn), lambda i, j, kk: (kk, j)),   # W
                pl.BlockSpec((1, tn), lambda i, j, kk: (0, j)),     # bias
            ],
            out_specs=(
                pl.BlockSpec((tm, tn), lambda i, j, kk: (i, j)),        # y
                pl.BlockSpec((1, 1, tn), lambda i, j, kk: (i, 0, j)),   # sum
                pl.BlockSpec((1, 1, tn), lambda i, j, kk: (i, 0, j)),   # sumsq
            ),
            scratch_shapes=[pltpu.VMEM((tm, tn), jnp.float32)],
        ),
        compiler_params=pltpu.CompilerParams(
            dimension_semantics=("parallel", "parallel", "arbitrary"),
            vmem_limit_bytes=32 * 1024 * 1024),
    )(A_p, Wm, bias_p.reshape(1, Np))

    # ---- finish BN statistics in plain JAX (tiny reductions) ---------------
    s = jnp.sum(s_part, axis=0)[0]            # (Np,)
    ss = jnp.sum(ss_part, axis=0)[0]          # (Np,)
    pad_rows = Mp - M
    if pad_rows:
        # Zero-padded A rows produce y == bias; remove them from the stats.
        s = s - pad_rows * bias_p
        ss = ss - pad_rows * bias_p * bias_p

    mean = s[:Cout] / M
    var = ss[:Cout] / M - mean * mean         # BatchNorm3d: biased variance
    var = jnp.maximum(var, 0.0)               # guard E[y^2]-E[y]^2 cancellation
    scale = gamma.astype(jnp.float32) / jnp.sqrt(var + eps)
    shift = beta.astype(jnp.float32) - mean * scale

    # ---- BN affine fused with slice / reshape / transpose by XLA -----------
    y = y_p[:M, :Cout]
    out = y * scale.reshape(1, Cout) + shift.reshape(1, Cout)
    return out.reshape(N, Do, Ho, Wo, Cout).transpose(0, 4, 1, 2, 3)


# -----------------------------------------------------------------------------
# Pure-JAX reference (for correctness check).
# -----------------------------------------------------------------------------
def reference(x, w, b, gamma, beta, stride, eps=1e-5):
    pad = w.shape[2] // 2
    y = jax.lax.conv_general_dilated(
        x, w, window_strides=(stride, stride, stride),
        padding=[(pad, pad)] * 3,
        dimension_numbers=("NCDHW", "OIDHW", "NCDHW"))
    y = y + b.reshape(1, -1, 1, 1, 1)
    mean = jnp.mean(y, axis=(0, 2, 3, 4), keepdims=True)
    var = jnp.mean((y - mean) ** 2, axis=(0, 2, 3, 4), keepdims=True)  # biased
    return ((y - mean) / jnp.sqrt(var + eps)) * gamma.reshape(1, -1, 1, 1, 1) \
        + beta.reshape(1, -1, 1, 1, 1)


if __name__ == "__main__":
    # Small shapes consistent with the module: Conv3d expects NCDHW.
    N, Cin, Cout = 2, 4, 8
    D = H = W = 8
    k, stride = 3, 1

    key = jax.random.PRNGKey(0)
    kx, kw, kb = jax.random.split(key, 3)
    x = jax.random.normal(kx, (N, Cin, D, H, W), dtype=jnp.float32)

    # Deterministic parameter init (PyTorch Conv3d default: U(-1/sqrt(fan_in), ...)).
    fan_in = Cin * k * k * k
    bound = 1.0 / math.sqrt(fan_in)
    w = jax.random.uniform(kw, (Cout, Cin, k, k, k), jnp.float32, -bound, bound)
    b = jax.random.uniform(kb, (Cout,), jnp.float32, -bound, bound)
    gamma = jnp.ones((Cout,), jnp.float32)   # BatchNorm3d default weight
    beta = jnp.zeros((Cout,), jnp.float32)   # BatchNorm3d default bias

    out = conv3d_bn_forward(x, w, b, gamma, beta, stride)
    out = jax.block_until_ready(out)

    ref = reference(x, w, b, gamma, beta, stride)
    assert out.shape == ref.shape == (N, Cout, D, H, W)
    # Tolerance accounts for bf16 MXU operands (f32 accumulation).
    assert jnp.allclose(out, ref, atol=5e-2, rtol=5e-2), \
        f"max abs err = {jnp.max(jnp.abs(out - ref))}"

    print("KERNEL_OK")
</pallas_src>

<mosaic_0001>
module attributes {stable_mosaic.version = 11 : i64} {
  func.func @conv_matmul_stats_kernel(%arg0: i32, %arg1: i32, %arg2: i32, %arg3: memref<512x128xbf16, #tpu.memory_space<vmem>>, %arg4: memref<128x128xbf16, #tpu.memory_space<vmem>>, %arg5: memref<1x128xf32, #tpu.memory_space<vmem>>, %arg6: memref<512x128xf32, #tpu.memory_space<vmem>>, %arg7: memref<1x1x128xf32, #tpu.memory_space<vmem>>, %arg8: memref<1x1x128xf32, #tpu.memory_space<vmem>>, %arg9: memref<512x128xf32, #tpu.memory_space<vmem>>) attributes {dimension_semantics = [#tpu.dimension_semantics<parallel>, #tpu.dimension_semantics<parallel>, #tpu.dimension_semantics<arbitrary>], iteration_bounds = array<i64: 2, 1, 1>, scalar_prefetch = 0 : i64, scratch_operands = 1 : i64, tpu.core_type = #tpu.core_type<tc>, window_params = [{transform_indices = @transform_0, window_bounds = array<i64: 512, 128>}, {transform_indices = @transform_1, window_bounds = array<i64: 128, 128>}, {transform_indices = @transform_2, window_bounds = array<i64: 1, 128>}, {transform_indices = @transform_3, window_bounds = array<i64: 512, 128>}, {transform_indices = @transform_4, window_bounds = array<i64: 1, 1, 128>}, {transform_indices = @transform_5, window_bounds = array<i64: 1, 1, 128>}]} {
    %c0_i32 = arith.constant 0 : i32
    %0 = arith.cmpi eq, %arg2, %c0_i32 : i32
    %1 = arith.extui %0 : i1 to i32
    %c0_i32_0 = arith.constant 0 : i32
    %2 = arith.cmpi ne, %1, %c0_i32_0 : i32
    scf.if %2 {
      %cst_10 = arith.constant 0.000000e+00 : f32
      %12 = vector.broadcast %cst_10 : f32 to vector<512x128xf32>
      %c0_11 = arith.constant 0 : index
      %c0_12 = arith.constant 0 : index
      %13 = vector.load %arg9[%c0_11, %c0_12] : memref<512x128xf32, #tpu.memory_space<vmem>>, vector<512x128xf32>
      tpu.vector_store %arg9[%c0_11, %c0_12], %12 {strides = array<i32>} : memref<512x128xf32, #tpu.memory_space<vmem>>, vector<512x128xf32>,
    } else {
    }
    %c0 = arith.constant 0 : index
    %c0_1 = arith.constant 0 : index
    %3 = vector.load %arg9[%c0, %c0_1] : memref<512x128xf32, #tpu.memory_space<vmem>>, vector<512x128xf32>
    %c0_2 = arith.constant 0 : index
    %c0_3 = arith.constant 0 : index
    %4 = vector.load %arg3[%c0_2, %c0_3] : memref<512x128xbf16, #tpu.memory_space<vmem>>, vector<512x128xbf16>
    %c0_4 = arith.constant 0 : index
    %c0_5 = arith.constant 0 : index
    %5 = vector.load %arg4[%c0_4, %c0_5] : memref<128x128xbf16, #tpu.memory_space<vmem>>, vector<128x128xbf16>
    %cst = arith.constant dense<0.000000e+00> : vector<512x128xf32>
    %6 = tpu.matmul %4, %5, %cst {dimension_numbers = #tpu.dot_dimension_numbers<[1], [0], [0], [1], [0, 0, 1, 1], [], []>} : vector<512x128xbf16>, vector<128x128xbf16>, vector<512x128xf32> -> vector<512x128xf32>
    %7 = arith.addf %3, %6 : vector<512x128xf32>
    %c0_6 = arith.constant 0 : index
    %c0_7 = arith.constant 0 : index
    %8 = vector.load %arg9[%c0_6, %c0_7] : memref<512x128xf32, #tpu.memory_space<vmem>>, vector<512x128xf32>
    tpu.vector_store %arg9[%c0_6, %c0_7], %7 {strides = array<i32>} : memref<512x128xf32, #tpu.memory_space<vmem>>, vector<512x128xf32>,
    %c0_i32_8 = arith.constant 0 : i32
    %9 = arith.cmpi eq, %arg2, %c0_i32_8 : i32
    %10 = arith.extui %9 : i1 to i32
    %c0_i32_9 = arith.constant 0 : i32
    %11 = arith.cmpi ne, %10, %c0_i32_9 : i32
    scf.if %11 {
      %c0_10 = arith.constant 0 : index
      %c0_11 = arith.constant 0 : index
      %12 = vector.load %arg9[%c0_10, %c0_11] : memref<512x128xf32, #tpu.memory_space<vmem>>, vector<512x128xf32>
      %c0_12 = arith.constant 0 : index
      %c0_13 = arith.constant 0 : index
      %13 = vector.load %arg5[%c0_12, %c0_13] : memref<1x128xf32, #tpu.memory_space<vmem>>, vector<1x128xf32>
      %14 = vector.broadcast %13 : vector<1x128xf32> to vector<512x128xf32>
      %15 = arith.addf %12, %14 : vector<512x128xf32>
      %c0_14 = arith.constant 0 : index
      %c0_15 = arith.constant 0 : index
      %16 = vector.load %arg6[%c0_14, %c0_15] : memref<512x128xf32, #tpu.memory_space<vmem>>, vector<512x128xf32>
      tpu.vector_store %arg6[%c0_14, %c0_15], %15 {strides = array<i32>} : memref<512x128xf32, #tpu.memory_space<vmem>>, vector<512x128xf32>,
      %cst_16 = arith.constant dense<0.000000e+00> : vector<128xf32>
      %17 = vector.multi_reduction <add>, %15, %cst_16 [0] : vector<512x128xf32> to vector<128xf32>
      %18 = vector.shape_cast %17 : vector<128xf32> to vector<1x1x128xf32>
      %c0_17 = arith.constant 0 : index
      %c0_18 = arith.constant 0 : index
      %c0_19 = arith.constant 0 : index
      %19 = vector.load %arg7[%c0_17, %c0_18, %c0_19] : memref<1x1x128xf32, #tpu.memory_space<vmem>>, vector<1x1x128xf32>
      tpu.vector_store %arg7[%c0_17, %c0_18, %c0_19], %18 {strides = array<i32>} : memref<1x1x128xf32, #tpu.memory_space<vmem>>, vector<1x1x128xf32>,
      %20 = arith.mulf %15, %15 : vector<512x128xf32>
      %cst_20 = arith.constant dense<0.000000e+00> : vector<128xf32>
      %21 = vector.multi_reduction <add>, %20, %cst_20 [0] : vector<512x128xf32> to vector<128xf32>
      %22 = vector.shape_cast %21 : vector<128xf32> to vector<1x1x128xf32>
      %c0_21 = arith.constant 0 : index
      %c0_22 = arith.constant 0 : index
      %c0_23 = arith.constant 0 : index
      %23 = vector.load %arg8[%c0_21, %c0_22, %c0_23] : memref<1x1x128xf32, #tpu.memory_space<vmem>>, vector<1x1x128xf32>
      tpu.vector_store %arg8[%c0_21, %c0_22, %c0_23], %22 {strides = array<i32>} : memref<1x1x128xf32, #tpu.memory_space<vmem>>, vector<1x1x128xf32>,
    } else {
    }
    return
  }
  func.func @transform_0(%arg0: i32, %arg1: i32, %arg2: i32) -> (i32, i32) {
    %c0_i32 = arith.constant 0 : i32
    return %arg0, %arg2 : i32, i32
  }
  func.func @transform_1(%arg0: i32, %arg1: i32, %arg2: i32) -> (i32, i32) {
    %c0_i32 = arith.constant 0 : i32
    return %arg2, %arg1 : i32, i32
  }
  func.func @transform_2(%arg0: i32, %arg1: i32, %arg2: i32) -> (i32, i32) {
    %c0_i32 = arith.constant 0 : i32
    %c0_i32_0 = arith.constant 0 : i32
    return %c0_i32, %arg1 : i32, i32
  }
  func.func @transform_3(%arg0: i32, %arg1: i32, %arg2: i32) -> (i32, i32) {
    %c0_i32 = arith.constant 0 : i32
    return %arg0, %arg1 : i32, i32
  }
  func.func @transform_4(%arg0: i32, %arg1: i32, %arg2: i32) -> (i32, i32, i32) {
    %c0_i32 = arith.constant 0 : i32
    %c0_i32_0 = arith.constant 0 : i32
    return %arg0, %c0_i32, %arg1 : i32, i32, i32
  }
  func.func @transform_5(%arg0: i32, %arg1: i32, %arg2: i32) -> (i32, i32, i32) {
    %c0_i32 = arith.constant 0 : i32
    %c0_i32_0 = arith.constant 0 : i32
    return %arg0, %c0_i32, %arg1 : i32, i32, i32
  }
}

</mosaic_0001>

<bundles_post_ra>
// kernel: tpu_custom_call.1
= control target key start
LH: loop header
LB: loop body
LE: loop exit
PB: predicated region body
PF: predicated region fallthrough
CT: control target
= control target key end

     0   :  { %11 = vsyncpa [#allocation4], 0  ;;  %s3053_s0 = inlined_call_operand.hbm [shape: bf16[1024,128], index: 0, kind: input, shape index: {}]   ;;  %s3054_s1 = inlined_call_operand.hbm [shape: bf16[128,128], index: 1, kind: input, shape index: {}]   ;;  %s3055_s2 = inlined_call_operand.vmem [shape: f32[1,128], index: 2, kind: input, shape index: {}]   ;;  %s3056_s3 = inlined_call_operand.hbm [shape: f32[1024,128], index: 3, kind: output, shape index: {0}]   ;;  %s3057_s4 = inlined_call_operand.hbm [shape: f32[2,1,128], index: 4, kind: output, shape index: {1}]   ;;  %s3058_s5 = inlined_call_operand.hbm [shape: f32[2,1,128], index: 5, kind: output, shape index: {2}]  }
   0x1   :  { %13 = vsyncpa [#allocation4 + $0x1], 0 }
   0x2   :  { %14 = vsyncpa [#allocation7], 0 }
   0x3   :  { %15 = vsyncpa [#allocation5], 0 }
   0x4   :  { %17 = vsyncpa [#allocation5 + $0x1], 0 }
   0x5   :  { %18 = vsyncpa [#allocation10], 0 }
   0x6   :  { %20 = vsyncpa [#allocation10 + $0x1], 0  ;;  %s2397_s18 = smov 0   ;;  %s2399_s19 = smov 0  }
   0x7   :  { %s2401_s20 = smov 0   ;;  %s2403_s21 = smov 0  }
   0x8   :  { %s2405_s22 = smov 0   ;;  %s2407_s23 = smov 0  }
   0x9 LB: > { %s2428_s24 = sadd.s32 4294967295, %s2356_s23   ;;  %s3062_s25 = sadd.s32 4294967294, %s2356_s23   ;;  %s2356_s23 = sphi %s2407_s23, %s26_s23   ;;  %s2352_s22 = sphi %s2405_s22, %s3084_s22   ;;  %s2348_s21 = sphi %s2403_s21, %s3083_s21   ;;  %s2344_s20 = sphi %s2401_s20, %s3082_s20   ;;  %s2340_s19 = sphi %s2399_s19, %s3081_s19   ;;  %s2336_s18 = sphi %s2397_s18, %s3080_s18  }
   0xa   : > { %p67_p0 = scmp.ne.s32.totalorder %s2340_s19, %s2336_s18  ;;  %p3059_p1 = scmp.eq.s32.totalorder %s2428_s24, 0 }
   0xb   : > { %p153_p3 = scmp.eq.s32.totalorder %s3062_s25, 1  ;;  %p1828_p5 = scmp.ge.s32.totalorder %s2356_s23, 1 }
   0xc   : > { %p2439_p4 = por %p3059_p1, %p67_p0  ;;  %p216_p7 = scmp.lt.s32.totalorder %s2356_s23, 3 }
   0xd   : > { %p2444_p6 = por %p153_p3, %p67_p0  ;;  %s2358_s29 = smov [#allocation6]  }
   0xe   : > { %s3064_s26 = scalar_select %p2439_p4, 1, 0 }
   0xf   : > { %s3065_s27 = scalar_select %p2444_p6, 1, 0 }
  0x10   : > { %p2449_p8 = pnand %p1828_p5, %p216_p7  ;;  %s232_s30 = sshll.u32 %s2358_s29, 4  ;;  %s233_s30 = int_to_ptr.vmem [resolvable:$true] %s232_s30 }
  0x11   : > { %s45_s7 = sadd.s32 1, %s2352_s22  ;;  %s2152_s10 = scalar_lea.hbm %s3054_s1, 1024 }
  0x12   : > { %s3066_s28 = scalar_select %p2449_p8, 1, 0 }
  0x13   : > { %p2037_p9 = pneg %p2449_p8  ;;  %p2153_p12 = scmp.ne.s32.totalorder %s3054_s1, %s2152_s10 }
  0x14   : > { %p2159_p5 = scmp.lt.u32.totalorder %s2152_s10, %s3054_s1 }
  0x15   : > { %p2458_p11 = pnand %p2037_p9, %p3059_p1 }
  0x17   : > { %p2154_p13 = pneg %p2458_p11 }
  0x19   : > { %p2155_p0 = pnand %p2154_p13, %p2153_p12 }
  0x1b   : > { %p2156_p3 = pneg %p2155_p0 }
  0x1d   : > { %p2161_p7 = pnand %p2159_p5, %p2156_p3 }
  0x1f   : > { %2164 = shalt.err (!%p2161_p7)
}
  0x20   : > { %s2165_s15 = scalar_lea.vmem %s233_s30, 1024  ;;  %p2173_p2 = scmp.lt.s32.totalorder %s233_s30, %s233_s30 }
  0x21   : > { %p2166_p9 = scmp.ne.s32.totalorder %s233_s30, %s2165_s15  ;;  %p2174_p6 = scmp.lt.s32.totalorder %s2165_s15, %s2165_s15 }
  0x23   : > { %p2168_p10 = pnand %p2166_p9, %p2154_p13  ;;  %p2175_p4 = por %p2174_p6, %p2173_p2 }
  0x25   : > { %p2169_p1 = pneg %p2168_p10 }
  0x27   : > { %p2176_p8 = pnand %p2175_p4, %p2169_p1 }
  0x29   : > { %2179 = shalt.err (!%p2176_p8)
}
  0x2a   : > { %s3063_s16 = smov 64   ;;  %s2360_s17 = smov 4  }
  0x2b   : > { %2040 = dma.hbm_to_vmem [thread:$0]  (!%p2458_p11), %s3054_s1, 1024, %s233_s30, [#allocation7], %s3063_s16, %s3063_s16, %s2360_s17  }
  0x2c   : > { %p47_p1 = scmp.ge.s32.totalorder %s45_s7, 2  ;;  %s54_s9 = sadd.s32 1, %s2344_s20 }
  0x2d   : > { %p61_p2 = scmp.ne.s32.totalorder %s2344_s20, %s2340_s19  ;;  %p62_p4 = scmp.eq.s32.totalorder %s2356_s23, 0 }
  0x2e   : > { %s3086_s7 = smov (%p47_p1, %s45_s7), 0  ;;  %p3069_p8 = scmp.eq.s32.totalorder %s2428_s24, 1 }
  0x2f   : > { %p2488_p6 = por %p62_p4, %p61_p2  ;;  %s49_s11 = ssub.s32 %s2352_s22, %s3086_s7 }
  0x30   : > { %p2494_p10 = por %p3069_p8, %p61_p2  ;;  %p2056_p12 = scmp.lt.s32.totalorder %s2356_s23, 2 }
  0x31   : > { %p52_p11 = scmp.eq.s32.totalorder %s49_s11, 0  ;;  %s252_s30 = sand.u32 1, %s2344_s20  }
  0x32   : > { %s1832_s12 = sshll.u32 %s252_s30, 8  ;;  %s1887_s14 = sshll.u32 %s2352_s22, 12 }
  0x33   : > { %s2503_s13 = scalar_select %p52_p11, %s2344_s20, %s54_s9  }
  0x34   : > { %s2509_s8 = scalar_lea.hbm %s3053_s0, %s1887_s14  ;;  %s256_s25 = scalar_lea.vmem [#allocation3], %s1832_s12 }
  0x35   : > { %s264_s16 = sshll.u32 %s256_s25, 4  ;;  %p2515_p13 = pnand %p2056_p12, %p2488_p6  ;;  %s2511_s16 = int_to_ptr.vmem [resolvable:$true] %s264_s16 }
  0x36   : > { %s2519_s9 = scalar_lea.sflag [#allocation4], %s252_s30  ;;  %s2180_s15 = scalar_lea.hbm %s2509_s8, 4096 }
  0x37   : > { %p2181_p0 = scmp.ne.s32.totalorder %s2509_s8, %s2180_s15  ;;  %p2182_p3 = pneg %p2515_p13 }
  0x38   : > { %s2185_s10 = scalar_lea.hbm %s3053_s0, 8192  ;;  %p2186_p9 = scmp.lt.u32.totalorder %s2509_s8, %s3053_s0 }
  0x39   : > { %p2183_p5 = pnand %p2182_p3, %p2181_p0  ;;  %p2187_p1 = scmp.lt.u32.totalorder %s2185_s10, %s2180_s15 }
  0x3a   : > { %p2189_p4 = scmp.lt.u32.totalorder %s2180_s15, %s2509_s8 }
  0x3b   : > { %p2184_p7 = pneg %p2183_p5  ;;  %p2188_p2 = por %p2187_p1, %p2186_p9 }
  0x3d   : > { %p2190_p6 = por %p2189_p4, %p2188_p2 }
  0x3f   : > { %p2191_p8 = pnand %p2190_p6, %p2184_p7 }
  0x41   : > { %2194 = shalt.err (!%p2191_p8)
}
  0x42   : > { %s2195_s30 = scalar_lea.vmem %s2511_s16, 4096  ;;  %s2361_s25 = smov [#allocation3]  }
  0x43   : > { %p2196_p12 = scmp.ne.s32.totalorder %s2511_s16, %s2195_s30  ;;  %s2200_s12 = sshll.u32 %s2361_s25, 4  ;;  %s2201_s12 = int_to_ptr.vmem [resolvable:$false] %s2200_s12 }
  0x44   : > { %s2202_s14 = scalar_lea.vmem %s2201_s12, 8192  ;;  %p2203_p5 = scmp.lt.s32.totalorder %s2511_s16, %s2201_s12 }
  0x45   : > { %p2198_p11 = pnand %p2196_p12, %p2182_p3  ;;  %p2204_p9 = scmp.lt.s32.totalorder %s2202_s14, %s2195_s30 }
  0x47   : > { %p2199_p0 = pneg %p2198_p11  ;;  %p2205_p1 = por %p2204_p9, %p2203_p5 }
  0x49   : > { %p2206_p2 = pnand %p2205_p1, %p2199_p0 }
  0x4b   : > { %2209 = shalt.err (!%p2206_p2)
}
  0x4c   : > { %s3072_s15 = smov 64   ;;  %p3073_p3 = scmp.ne.s32.totalorder %s3066_s28, 0 }
  0x4d   : > { %2044 = dma.hbm_to_vmem [thread:$0]  (!%p2515_p13), %s2509_s8, 4096, %s2511_s16, %s2519_s9, %s3072_s15, %s3072_s15, %s2360_s17  }
  0x4e   : > { %276 = sbr.rel (%p3073_p3) target bundleno = 524 (0x20c), region = 32  ;;  %s2553_s10 = sand.u32 (!%p3073_p3), 1, %s2340_s19  }
  0x4f   : > { %s1836_s29 = sshll.u32 (!%p3073_p3), %s2553_s10, 8  ;;  %s279_s30 = scalar_lea.sflag (!%p3073_p3), [#allocation4], %s2553_s10 }
  0x50   : > { %s2557_s25 = scalar_lea.vmem (!%p3073_p3), [#allocation3], %s1836_s29  ;;  %p3074_p7 = scmp.ne.s32.totalorder (!%p3073_p3), %s3064_s26, 0 }
  0x55   : > { %2319 = dma.done.wait (%p3074_p7), %s279_s30, 4096  }
  0x56   : > { %2321 = vsyncadd (%p3074_p7), %s279_s30, 4294963200  ;;  %p3075_p13 = scmp.eq.s32.totalorder %s2428_s24, 0 }
  0x58   : > { %2323 = dma.done.wait (%p3075_p13), [#allocation7], 1024   ;;  %p3076_p4 = pmov %p3075_p13 }
  0x59   : > { %v2112_v0 = vld [vmem:[#allocation6] sm:$0xff]   ;;  %v2113_v1 = vld [vmem:[#allocation6 + $0x8] sm:$0xff]   ;;  %v2114_v2 = vld [vmem:[#allocation6 + $0x10] sm:$0xff]   ;;  %s1838_s26 = sshll.u32 %s2553_s10, 9  ;;  %s1888_s8 = sshll.u32 %s2348_s21, 13 }
  0x5a   : > { %2325 = vsyncadd (%p3076_p4), [#allocation7], 4294966272  ;;  %1929 = vmatprep.subr.bf16.mxu0 %v2112_v0  ;;  %2009 = vmatprep.subr.bf16.mxu1 %v2112_v0  ;;  %v2115_v3 = vld [vmem:[#allocation6 + $0x18] sm:$0xff]   ;;  %v2120_v4 = vld [vmem:[%s2557_s25] sm:$0xff]   ;;  %s2613_s17 = scalar_lea.vmem [#allocation8], %s1838_s26  ;;  %s2827_s14 = scalar_lea.hbm %s3056_s3, %s1888_s8 }
  0x5b   : > { %1930 = vmatpush3.bf16.msra.mxu0 %v2112_v0  ;;  %2017 = vmatpush3.bf16.msra.mxu1 %v2112_v0  ;;  %v2116_v5 = vld [vmem:[#allocation6 + $0x20] sm:$0xff]   ;;  %v2117_v6 = vld [vmem:[#allocation6 + $0x28] sm:$0xff]   ;;  %v2118_v7 = vld [vmem:[#allocation6 + $0x30] sm:$0xff]   ;;  %s1629_s11 = sshll.u32 %s2613_s17, 4  ;;  %s1607_s15 = scalar_lea.sflag [#allocation5], %s2553_s10  ;;  %s2829_s11 = int_to_ptr.vmem [resolvable:$true] %s1629_s11 }
  0x5c   : > { %1931 = vmatprep.subr.bf16.mxu0 %v2113_v1  ;;  %2010 = vmatprep.subr.bf16.mxu1 %v2113_v1  ;;  %v2119_v8 = vld [vmem:[#allocation6 + $0x38] sm:$0xff]   ;;  %v2136_v9 = vld [vmem:[%s2557_s25 + $0x80] sm:$0xff]   ;;  %v2121_v10 = vld [vmem:[%s2557_s25 + $0x8] sm:$0xff]   ;;  %s2210_s29 = scalar_lea.vmem %s2829_s11, 8192  ;;  %s2362_s30 = smov [#allocation8]  }
  0x5d   : > { %1945 = vmatprep.mubr.bf16.mxu0 %v2120_v4  ;;  %1977 = vmatprep.mubr.bf16.mxu1 %v2136_v9  ;;  %v2122_v11 = vld [vmem:[%s2557_s25 + $0x10] sm:$0xff]   ;;  %v2137_v12 = vld [vmem:[%s2557_s25 + $0x88] sm:$0xff]   ;;  %v2123_v14 = vld [vmem:[%s2557_s25 + $0x18] sm:$0xff]   ;;  %p2211_p6 = scmp.ne.s32.totalorder %s2829_s11, %s2210_s29 }
  0x5e   : > { %v2138_v13 = vld [vmem:[%s2557_s25 + $0x90] sm:$0xff]   ;;  %v2124_v15 = vld [vmem:[%s2557_s25 + $0x20] sm:$0xff]   ;;  %v2139_v16 = vld [vmem:[%s2557_s25 + $0x98] sm:$0xff]  }
  0x5f   : > { %1932 = vmatpush3.bf16.msra.mxu0 %v2113_v1  ;;  %2018 = vmatpush3.bf16.msra.mxu1 %v2113_v1  ;;  %v2140_v17 = vld [vmem:[%s2557_s25 + $0xa0] sm:$0xff]   ;;  %v2125_v18 = vld [vmem:[%s2557_s25 + $0x28] sm:$0xff]   ;;  %v2126_v20 = vld [vmem:[%s2557_s25 + $0x30] sm:$0xff]   ;;  %p2212_p8 = pnand %p2211_p6, %p2494_p10 }
  0x60   : > { %1933 = vmatprep.subr.bf16.mxu0 %v2114_v2  ;;  %2011 = vmatprep.subr.bf16.mxu1 %v2114_v2  ;;  %v2141_v19 = vld [vmem:[%s2557_s25 + $0xa8] sm:$0xff]   ;;  %v2142_v21 = vld [vmem:[%s2557_s25 + $0xb0] sm:$0xff]   ;;  %v2127_v22 = vld [vmem:[%s2557_s25 + $0x38] sm:$0xff]  }
  0x61   : > { %v2143_v23 = vld [vmem:[%s2557_s25 + $0xb8] sm:$0xff]   ;;  %v2128_v24 = vld [vmem:[%s2557_s25 + $0x40] sm:$0xff]   ;;  %v2129_v26 = vld [vmem:[%s2557_s25 + $0x48] sm:$0xff]   ;;  %p2213_p12 = pneg %p2212_p8 }
  0x62   : > { %v2144_v25 = vld [vmem:[%s2557_s25 + $0xc0] sm:$0xff]   ;;  %v2145_v27 = vld [vmem:[%s2557_s25 + $0xc8] sm:$0xff]   ;;  %v2130_v28 = vld [vmem:[%s2557_s25 + $0x50] sm:$0xff]  }
  0x63   : > { %1934 = vmatpush3.bf16.msra.mxu0 %v2114_v2  ;;  %2019 = vmatpush3.bf16.msra.mxu1 %v2114_v2  ;;  %v2146_v29 = vld [vmem:[%s2557_s25 + $0xd0] sm:$0xff]   ;;  %v2131_v30 = vld [vmem:[%s2557_s25 + $0x58] sm:$0xff]   ;;  %v2132_v32 = vld [vmem:[%s2557_s25 + $0x60] sm:$0xff]  }
  0x64   : > { %1935 = vmatprep.subr.bf16.mxu0 %v2115_v3  ;;  %2012 = vmatprep.subr.bf16.mxu1 %v2115_v3  ;;  %v2147_v31 = vld [vmem:[%s2557_s25 + $0xd8] sm:$0xff]   ;;  %v2148_v33 = vld [vmem:[%s2557_s25 + $0xe0] sm:$0xff]   ;;  %v2133_v34 = vld [vmem:[%s2557_s25 + $0x68] sm:$0xff]  }
  0x65   : > { %v2149_v35 = vld [vmem:[%s2557_s25 + $0xe8] sm:$0xff]   ;;  %v2134_v36 = vld [vmem:[%s2557_s25 + $0x70] sm:$0xff]   ;;  %v2135_v38 = vld [vmem:[%s2557_s25 + $0x78] sm:$0xff]  }
  0x66   : > { %v2150_v37 = vld [vmem:[%s2557_s25 + $0xf0] sm:$0xff]   ;;  %v2151_v39 = vld [vmem:[%s2557_s25 + $0xf8] sm:$0xff]   ;;  %v2603_v40 = vld [vmem:[%s3055_s2] ss:$0 sm:$0xff]  ;;  %s2214_s25 = sshll.u32 %s2362_s30, 4  ;;  %s2215_s25 = int_to_ptr.vmem [resolvable:$false] %s2214_s25 }
  0x67   : > { %1936 = vmatpush3.bf16.msra.mxu0 %v2115_v3  ;;  %2020 = vmatpush3.bf16.msra.mxu1 %v2115_v3  ;;  %s2216_s26 = scalar_lea.vmem %s2215_s25, 16384  ;;  %p2217_p11 = scmp.lt.s32.totalorder %s2829_s11, %s2215_s25 }
  0x68   : > { %1937 = vmatprep.subr.bf16.mxu0 %v2116_v5  ;;  %2013 = vmatprep.subr.bf16.mxu1 %v2116_v5  ;;  %p2218_p0 = scmp.lt.s32.totalorder %s2216_s26, %s2210_s29 }
  0x6a   : > { %p2219_p5 = por %p2218_p0, %p2217_p11 }
  0x6b   : > { %1938 = vmatpush3.bf16.msra.mxu0 %v2116_v5  ;;  %2021 = vmatpush3.bf16.msra.mxu1 %v2116_v5 }
  0x6c   : > { %1939 = vmatprep.subr.bf16.mxu0 %v2117_v6  ;;  %2014 = vmatprep.subr.bf16.mxu1 %v2117_v6  ;;  %p2220_p9 = pnand %p2219_p5, %p2213_p12 }
  0x6f   : > { %1940 = vmatpush3.bf16.msra.mxu0 %v2117_v6  ;;  %2022 = vmatpush3.bf16.msra.mxu1 %v2117_v6 }
  0x70   : > { %1941 = vmatprep.subr.bf16.mxu0 %v2118_v7  ;;  %2015 = vmatprep.subr.bf16.mxu1 %v2118_v7 }
  0x73   : > { %1942 = vmatpush3.bf16.msra.mxu0 %v2118_v7  ;;  %2023 = vmatpush3.bf16.msra.mxu1 %v2118_v7 }
  0x74   : > { %1943 = vmatprep.subr.bf16.mxu0 %v2119_v8  ;;  %2016 = vmatprep.subr.bf16.mxu1 %v2119_v8 }
  0x77   : > { %1944 = vmatpush3.bf16.msra.mxu0 %v2119_v8  ;;  %2024 = vmatpush3.bf16.msra.mxu1 %v2119_v8 }
  0x7a   : > { %1946 = vmatmul.mubr.bf16.vlgmr.msra.gmra.mrb[0].mxu0 %v2121_v10  ;;  %1978 = vmatmul.mubr.bf16.vlgmr.msra.gmra.mrb[0].mxu1 %v2137_v12 }
  0x7b   : > { %1949 = vmatprep.mubr.bf16.mxu0 %v2122_v11  ;;  %1981 = vmatprep.mubr.bf16.mxu1 %v2138_v13 }
  0x82   : > { %1950 = vmatmul.mubr.bf16.gmra.mrb[4].mxu0 %v2123_v14  ;;  %1982 = vmatmul.mubr.bf16.gmra.mrb[4].mxu1 %v2139_v16 }
  0x83   : > { %1953 = vmatprep.mubr.bf16.mxu0 %v2124_v15  ;;  %1985 = vmatprep.mubr.bf16.mxu1 %v2140_v17 }
  0x8a   : > { %1954 = vmatmul.mubr.bf16.gmra.mrb[8].mxu0 %v2125_v18  ;;  %1986 = vmatmul.mubr.bf16.gmra.mrb[8].mxu1 %v2141_v19 }
  0x8b   : > { %1957 = vmatprep.mubr.bf16.mxu0 %v2126_v20  ;;  %1989 = vmatprep.mubr.bf16.mxu1 %v2142_v21 }
  0x92   : > { %1958 = vmatmul.mubr.bf16.gmra.mrb[12].mxu0 %v2127_v22  ;;  %1990 = vmatmul.mubr.bf16.gmra.mrb[12].mxu1 %v2143_v23 }
  0x93   : > { %1961 = vmatprep.mubr.bf16.mxu0 %v2128_v24  ;;  %1993 = vmatprep.mubr.bf16.mxu1 %v2144_v25 }
  0x9a   : > { %1962 = vmatmul.mubr.bf16.gmra.mrb[16].mxu0 %v2129_v26  ;;  %1994 = vmatmul.mubr.bf16.gmra.mrb[16].mxu1 %v2145_v27 }
  0x9b   : > { %1965 = vmatprep.mubr.bf16.mxu0 %v2130_v28  ;;  %1997 = vmatprep.mubr.bf16.mxu1 %v2146_v29 }
  0xa2   : > { %1966 = vmatmul.mubr.bf16.gmra.mrb[20].mxu0 %v2131_v30  ;;  %1998 = vmatmul.mubr.bf16.gmra.mrb[20].mxu1 %v2147_v31 }
  0xa3   : > { %1969 = vmatprep.mubr.bf16.mxu0 %v2132_v32  ;;  %2001 = vmatprep.mubr.bf16.mxu1 %v2148_v33 }
  0xaa   : > { %1970 = vmatmul.mubr.bf16.gmra.mrb[24].mxu0 %v2133_v34  ;;  %2002 = vmatmul.mubr.bf16.gmra.mrb[24].mxu1 %v2149_v35 }
  0xab   : > { %1973 = vmatprep.mubr.bf16.mxu0 %v2134_v36  ;;  %2005 = vmatprep.mubr.bf16.mxu1 %v2150_v37 }
  0xb2   : > { %1974 = vmatmul.mubr.bf16.gmra.mrb[28].mxu0 %v2135_v38  ;;  %2006 = vmatmul.mubr.bf16.gmra.mrb[28].mxu1 %v2151_v39 }
 0x14d   : > { %v1947_v41 = vpop.f32.mrb[0].mxu0  ;;  %v1979_v42 = vpop.f32.mrb[0].mxu1 }
 0x14e   : > { %v1276_v43 = vadd.f32 %v1947_v41, %v2603_v40  ;;  %v817_v44 = vpop.f32.mrb[1].mxu0  ;;  %v2607_v45 = vadd.f32 %v1979_v42, %v2603_v40  ;;  %v945_v46 = vpop.f32.mrb[1].mxu1 }
 0x14f   : > { %v1274_v47 = vadd.f32 %v2603_v40, %v817_v44  ;;  %v1948_v48 = vpop.f32.mrb[2].mxu0  ;;  %v2611_v49 = vadd.f32 %v2603_v40, %v945_v46  ;;  %v1980_v50 = vpop.f32.mrb[2].mxu1 }
 0x150   : > { %1340 = vst [vmem:[%s2613_s17 + $0x10] sm:$0xff] %v1276_v43  ;;  %v1277_v51 = vadd.f32 %v1948_v48, %v2603_v40  ;;  %v820_v52 = vpop.f32.mrb[3].mxu0  ;;  %1372 = vst [vmem:[%s2613_s17 + $0x110] sm:$0xff] %v2607_v45  ;;  %v2620_v53 = vadd.f32 %v1980_v50, %v2603_v40  ;;  %v948_v54 = vpop.f32.mrb[3].mxu1  ;;  %v1474_v60 = vmul.f32 %v1276_v43, %v1276_v43 }
 0x151   : > { %1338 = vst [vmem:[%s2613_s17] sm:$0xff] %v1274_v47  ;;  %v1275_v55 = vadd.f32 %v2603_v40, %v820_v52  ;;  %1370 = vst [vmem:[%s2613_s17 + $0x100] sm:$0xff] %v2611_v49  ;;  %v2627_v56 = vadd.f32 %v2603_v40, %v948_v54  ;;  %v1472_v57 = vmul.f32 %v1274_v47, %v1274_v47 }
 0x152   : > { %1341 = vst [vmem:[%s2613_s17 + $0x18] sm:$0xff] %v1277_v51  ;;  %1373 = vst [vmem:[%s2613_s17 + $0x118] sm:$0xff] %v2620_v53  ;;  %v1475_v1 = vmul.f32 %v1277_v51, %v1277_v51 }
 0x153   : > { %1339 = vst [vmem:[%s2613_s17 + $0x8] sm:$0xff] %v1275_v55  ;;  %v1402_v58 = vadd.f32 %v1275_v55, %v1274_v47  ;;  %v1473_v59 = vmul.f32 %v1275_v55, %v1275_v55  ;;  %1371 = vst [vmem:[%s2613_s17 + $0x108] sm:$0xff] %v2627_v56 }
 0x155   : > { %v1403_v61 = vadd.f32 %v1402_v58, %v1276_v43  ;;  %v1536_v62 = vadd.f32 %v1473_v59, %v1472_v57  ;;  %v1951_v63 = vpop.f32.mrb[4].mxu0  ;;  %v1983_v0 = vpop.f32.mrb[4].mxu1 }
 0x156   : > { %v1280_v2 = vadd.f32 %v1951_v63, %v2603_v40  ;;  %v833_v3 = vpop.f32.mrb[5].mxu0  ;;  %v2637_v4 = vadd.f32 %v1983_v0, %v2603_v40  ;;  %v961_v5 = vpop.f32.mrb[5].mxu1 }
 0x157   : > { %v1537_v6 = vadd.f32 %v1536_v62, %v1474_v60  ;;  %v1278_v7 = vadd.f32 %v2603_v40, %v833_v3  ;;  %v1404_v8 = vadd.f32 %v1403_v61, %v1277_v51  ;;  %v1952_v9 = vpop.f32.mrb[6].mxu0  ;;  %v2641_v10 = vadd.f32 %v2603_v40, %v961_v5  ;;  %v1984_v11 = vpop.f32.mrb[6].mxu1 }
 0x158   : > { %1344 = vst [vmem:[%s2613_s17 + $0x30] sm:$0xff] %v1280_v2  ;;  %v1281_v12 = vadd.f32 %v1952_v9, %v2603_v40  ;;  %v836_v13 = vpop.f32.mrb[7].mxu0  ;;  %1376 = vst [vmem:[%s2613_s17 + $0x130] sm:$0xff] %v2637_v4  ;;  %v2648_v14 = vadd.f32 %v1984_v11, %v2603_v40  ;;  %v964_v15 = vpop.f32.mrb[7].mxu1  ;;  %v1478_v24 = vmul.f32 %v1280_v2, %v1280_v2 }
 0x159   : > { %1342 = vst [vmem:[%s2613_s17 + $0x20] sm:$0xff] %v1278_v7  ;;  %v1405_v16 = vadd.f32 %v1404_v8, %v1278_v7  ;;  %v1476_v17 = vmul.f32 %v1278_v7, %v1278_v7  ;;  %v1538_v18 = vadd.f32 %v1537_v6, %v1475_v1  ;;  %v1279_v19 = vadd.f32 %v2603_v40, %v836_v13 }
 0x15a   : > { %1374 = vst [vmem:[%s2613_s17 + $0x120] sm:$0xff] %v2641_v10  ;;  %1345 = vst [vmem:[%s2613_s17 + $0x38] sm:$0xff] %v1281_v12  ;;  %v2658_v20 = vadd.f32 %v2603_v40, %v964_v15  ;;  %v1479_v29 = vmul.f32 %v1281_v12, %v1281_v12 }
 0x15b   : > { %1377 = vst [vmem:[%s2613_s17 + $0x138] sm:$0xff] %v2648_v14  ;;  %v1539_v21 = vadd.f32 %v1538_v18, %v1476_v17  ;;  %1343 = vst [vmem:[%s2613_s17 + $0x28] sm:$0xff] %v1279_v19  ;;  %v1406_v22 = vadd.f32 %v1405_v16, %v1279_v19  ;;  %v1477_v23 = vmul.f32 %v1279_v19, %v1279_v19 }
 0x15c   : > { %1375 = vst [vmem:[%s2613_s17 + $0x128] sm:$0xff] %v2658_v20 }
 0x15d   : > { %v1407_v25 = vadd.f32 %v1406_v22, %v1280_v2  ;;  %v1540_v26 = vadd.f32 %v1539_v21, %v1477_v23  ;;  %v1955_v27 = vpop.f32.mrb[8].mxu0  ;;  %v1987_v28 = vpop.f32.mrb[8].mxu1 }
 0x15e   : > { %v1284_v30 = vadd.f32 %v1955_v27, %v2603_v40  ;;  %v849_v31 = vpop.f32.mrb[9].mxu0  ;;  %v2665_v32 = vadd.f32 %v1987_v28, %v2603_v40  ;;  %v977_v33 = vpop.f32.mrb[9].mxu1 }
 0x15f   : > { %v1541_v34 = vadd.f32 %v1540_v26, %v1478_v24  ;;  %v1282_v35 = vadd.f32 %v2603_v40, %v849_v31  ;;  %v1408_v36 = vadd.f32 %v1407_v25, %v1281_v12  ;;  %v1956_v37 = vpop.f32.mrb[10].mxu0  ;;  %v2669_v38 = vadd.f32 %v2603_v40, %v977_v33  ;;  %v1988_v39 = vpop.f32.mrb[10].mxu1 }
 0x160   : > { %1348 = vst [vmem:[%s2613_s17 + $0x50] sm:$0xff] %v1284_v30  ;;  %v1285_v41 = vadd.f32 %v1956_v37, %v2603_v40  ;;  %v852_v42 = vpop.f32.mrb[11].mxu0  ;;  %1380 = vst [vmem:[%s2613_s17 + $0x150] sm:$0xff] %v2665_v32  ;;  %v2676_v43 = vadd.f32 %v1988_v39, %v2603_v40  ;;  %v980_v44 = vpop.f32.mrb[11].mxu1  ;;  %v1482_v57 = vmul.f32 %v1284_v30, %v1284_v30 }
 0x161   : > { %1346 = vst [vmem:[%s2613_s17 + $0x40] sm:$0xff] %v1282_v35  ;;  %v1409_v46 = vadd.f32 %v1408_v36, %v1282_v35  ;;  %v1480_v47 = vmul.f32 %v1282_v35, %v1282_v35  ;;  %v1542_v48 = vadd.f32 %v1541_v34, %v1479_v29  ;;  %v1283_v50 = vadd.f32 %v2603_v40, %v852_v42 }
 0x162   : > { %1378 = vst [vmem:[%s2613_s17 + $0x140] sm:$0xff] %v2669_v38  ;;  %1349 = vst [vmem:[%s2613_s17 + $0x58] sm:$0xff] %v1285_v41  ;;  %v2686_v51 = vadd.f32 %v2603_v40, %v980_v44  ;;  %v1483_v62 = vmul.f32 %v1285_v41, %v1285_v41 }
 0x163   : > { %1381 = vst [vmem:[%s2613_s17 + $0x158] sm:$0xff] %v2676_v43  ;;  %v1543_v52 = vadd.f32 %v1542_v48, %v1480_v47  ;;  %1347 = vst [vmem:[%s2613_s17 + $0x48] sm:$0xff] %v1283_v50  ;;  %v1410_v54 = vadd.f32 %v1409_v46, %v1283_v50  ;;  %v1481_v55 = vmul.f32 %v1283_v50, %v1283_v50 }
 0x164   : > { %1379 = vst [vmem:[%s2613_s17 + $0x148] sm:$0xff] %v2686_v51 }
 0x165   : > { %v1411_v58 = vadd.f32 %v1410_v54, %v1284_v30  ;;  %v1544_v59 = vadd.f32 %v1543_v52, %v1481_v55  ;;  %v1959_v60 = vpop.f32.mrb[12].mxu0  ;;  %v1991_v61 = vpop.f32.mrb[12].mxu1 }
 0x166   : > { %v1288_v63 = vadd.f32 %v1959_v60, %v2603_v40  ;;  %v865_v0 = vpop.f32.mrb[13].mxu0  ;;  %v2693_v1 = vadd.f32 %v1991_v61, %v2603_v40  ;;  %v993_v2 = vpop.f32.mrb[13].mxu1 }
 0x167   : > { %v1545_v3 = vadd.f32 %v1544_v59, %v1482_v57  ;;  %v1286_v5 = vadd.f32 %v2603_v40, %v865_v0  ;;  %v1412_v6 = vadd.f32 %v1411_v58, %v1285_v41  ;;  %v1960_v7 = vpop.f32.mrb[14].mxu0  ;;  %v2697_v8 = vadd.f32 %v2603_v40, %v993_v2  ;;  %v1992_v9 = vpop.f32.mrb[14].mxu1 }
 0x168   : > { %1352 = vst [vmem:[%s2613_s17 + $0x70] sm:$0xff] %v1288_v63  ;;  %v1289_v11 = vadd.f32 %v1960_v7, %v2603_v40  ;;  %v868_v12 = vpop.f32.mrb[15].mxu0  ;;  %1384 = vst [vmem:[%s2613_s17 + $0x170] sm:$0xff] %v2693_v1  ;;  %v2704_v13 = vadd.f32 %v1992_v9, %v2603_v40  ;;  %v996_v15 = vpop.f32.mrb[15].mxu1  ;;  %v1486_v25 = vmul.f32 %v1288_v63, %v1288_v63 }
 0x169   : > { %1350 = vst [vmem:[%s2613_s17 + $0x60] sm:$0xff] %v1286_v5  ;;  %v1413_v16 = vadd.f32 %v1412_v6, %v1286_v5  ;;  %v1484_v17 = vmul.f32 %v1286_v5, %v1286_v5  ;;  %v1546_v18 = vadd.f32 %v1545_v3, %v1483_v62  ;;  %v1287_v19 = vadd.f32 %v2603_v40, %v868_v12 }
 0x16a   : > { %1382 = vst [vmem:[%s2613_s17 + $0x160] sm:$0xff] %v2697_v8  ;;  %1353 = vst [vmem:[%s2613_s17 + $0x78] sm:$0xff] %v1289_v11  ;;  %v2714_v21 = vadd.f32 %v2603_v40, %v996_v15  ;;  %v1487_v30 = vmul.f32 %v1289_v11, %v1289_v11 }
 0x16b   : > { %1385 = vst [vmem:[%s2613_s17 + $0x178] sm:$0xff] %v2704_v13  ;;  %v1547_v22 = vadd.f32 %v1546_v18, %v1484_v17  ;;  %1351 = vst [vmem:[%s2613_s17 + $0x68] sm:$0xff] %v1287_v19  ;;  %v1414_v23 = vadd.f32 %v1413_v16, %v1287_v19  ;;  %v1485_v24 = vmul.f32 %v1287_v19, %v1287_v19 }
 0x16c   : > { %1383 = vst [vmem:[%s2613_s17 + $0x168] sm:$0xff] %v2714_v21 }
 0x16d   : > { %v1415_v26 = vadd.f32 %v1414_v23, %v1288_v63  ;;  %v1548_v27 = vadd.f32 %v1547_v22, %v1485_v24  ;;  %v1963_v28 = vpop.f32.mrb[16].mxu0  ;;  %v1995_v29 = vpop.f32.mrb[16].mxu1 }
 0x16e   : > { %v1292_v31 = vadd.f32 %v1963_v28, %v2603_v40  ;;  %v881_v33 = vpop.f32.mrb[17].mxu0  ;;  %v2721_v34 = vadd.f32 %v1995_v29, %v2603_v40  ;;  %v1009_v35 = vpop.f32.mrb[17].mxu1 }
 0x16f   : > { %v1549_v36 = vadd.f32 %v1548_v27, %v1486_v25  ;;  %v1290_v37 = vadd.f32 %v2603_v40, %v881_v33  ;;  %v1416_v39 = vadd.f32 %v1415_v26, %v1289_v11  ;;  %v1964_v41 = vpop.f32.mrb[18].mxu0  ;;  %v2725_v42 = vadd.f32 %v2603_v40, %v1009_v35  ;;  %v1996_v44 = vpop.f32.mrb[18].mxu1 }
 0x170   : > { %1356 = vst [vmem:[%s2613_s17 + $0x90] sm:$0xff] %v1292_v31  ;;  %v1293_v46 = vadd.f32 %v1964_v41, %v2603_v40  ;;  %v884_v47 = vpop.f32.mrb[19].mxu0  ;;  %1388 = vst [vmem:[%s2613_s17 + $0x190] sm:$0xff] %v2721_v34  ;;  %v2732_v48 = vadd.f32 %v1996_v44, %v2603_v40  ;;  %v1012_v50 = vpop.f32.mrb[19].mxu1  ;;  %v1490_v62 = vmul.f32 %v1292_v31, %v1292_v31 }
 0x171   : > { %1354 = vst [vmem:[%s2613_s17 + $0x80] sm:$0xff] %v1290_v37  ;;  %v1417_v52 = vadd.f32 %v1416_v39, %v1290_v37  ;;  %v1488_v54 = vmul.f32 %v1290_v37, %v1290_v37  ;;  %v1550_v55 = vadd.f32 %v1549_v36, %v1487_v30  ;;  %v1291_v57 = vadd.f32 %v2603_v40, %v884_v47 }
 0x172   : > { %1386 = vst [vmem:[%s2613_s17 + $0x180] sm:$0xff] %v2725_v42  ;;  %1357 = vst [vmem:[%s2613_s17 + $0x98] sm:$0xff] %v1293_v46  ;;  %v2742_v58 = vadd.f32 %v2603_v40, %v1012_v50  ;;  %v1491_v5 = vmul.f32 %v1293_v46, %v1293_v46 }
 0x173   : > { %1389 = vst [vmem:[%s2613_s17 + $0x198] sm:$0xff] %v2732_v48  ;;  %v1551_v59 = vadd.f32 %v1550_v55, %v1488_v54  ;;  %1355 = vst [vmem:[%s2613_s17 + $0x88] sm:$0xff] %v1291_v57  ;;  %v1418_v60 = vadd.f32 %v1417_v52, %v1291_v57  ;;  %v1489_v61 = vmul.f32 %v1291_v57, %v1291_v57 }
 0x174   : > { %1387 = vst [vmem:[%s2613_s17 + $0x188] sm:$0xff] %v2742_v58 }
 0x175   : > { %v1419_v63 = vadd.f32 %v1418_v60, %v1292_v31  ;;  %v1552_v0 = vadd.f32 %v1551_v59, %v1489_v61  ;;  %v1967_v2 = vpop.f32.mrb[20].mxu0  ;;  %v1999_v3 = vpop.f32.mrb[20].mxu1 }
 0x176   : > { %v1296_v6 = vadd.f32 %v1967_v2, %v2603_v40  ;;  %v897_v7 = vpop.f32.mrb[21].mxu0  ;;  %v2749_v9 = vadd.f32 %v1999_v3, %v2603_v40  ;;  %v1025_v11 = vpop.f32.mrb[21].mxu1 }
 0x177   : > { %v1553_v12 = vadd.f32 %v1552_v0, %v1490_v62  ;;  %v1294_v15 = vadd.f32 %v2603_v40, %v897_v7  ;;  %v1420_v16 = vadd.f32 %v1419_v63, %v1293_v46  ;;  %v1968_v17 = vpop.f32.mrb[22].mxu0  ;;  %v2753_v18 = vadd.f32 %v2603_v40, %v1025_v11  ;;  %v2000_v19 = vpop.f32.mrb[22].mxu1 }
 0x178   : > { %1360 = vst [vmem:[%s2613_s17 + $0xb0] sm:$0xff] %v1296_v6  ;;  %v1297_v22 = vadd.f32 %v1968_v17, %v2603_v40  ;;  %v900_v23 = vpop.f32.mrb[23].mxu0  ;;  %1392 = vst [vmem:[%s2613_s17 + $0x1b0] sm:$0xff] %v2749_v9  ;;  %v2760_v24 = vadd.f32 %v2000_v19, %v2603_v40  ;;  %v1028_v25 = vpop.f32.mrb[23].mxu1  ;;  %v1494_v36 = vmul.f32 %v1296_v6, %v1296_v6 }
 0x179   : > { %1358 = vst [vmem:[%s2613_s17 + $0xa0] sm:$0xff] %v1294_v15  ;;  %v1421_v26 = vadd.f32 %v1420_v16, %v1294_v15  ;;  %v1492_v27 = vmul.f32 %v1294_v15, %v1294_v15  ;;  %v1554_v28 = vadd.f32 %v1553_v12, %v1491_v5  ;;  %v1295_v29 = vadd.f32 %v2603_v40, %v900_v23 }
 0x17a   : > { %1390 = vst [vmem:[%s2613_s17 + $0x1a0] sm:$0xff] %v2753_v18  ;;  %1361 = vst [vmem:[%s2613_s17 + $0xb8] sm:$0xff] %v1297_v22  ;;  %v2770_v30 = vadd.f32 %v2603_v40, %v1028_v25  ;;  %v1495_v46 = vmul.f32 %v1297_v22, %v1297_v22 }
 0x17b   : > { %1393 = vst [vmem:[%s2613_s17 + $0x1b8] sm:$0xff] %v2760_v24  ;;  %v1555_v31 = vadd.f32 %v1554_v28, %v1492_v27  ;;  %1359 = vst [vmem:[%s2613_s17 + $0xa8] sm:$0xff] %v1295_v29  ;;  %v1422_v33 = vadd.f32 %v1421_v26, %v1295_v29  ;;  %v1493_v35 = vmul.f32 %v1295_v29, %v1295_v29 }
 0x17c   : > { %1391 = vst [vmem:[%s2613_s17 + $0x1a8] sm:$0xff] %v2770_v30 }
 0x17d   : > { %v1423_v37 = vadd.f32 %v1422_v33, %v1296_v6  ;;  %v1556_v39 = vadd.f32 %v1555_v31, %v1493_v35  ;;  %v1971_v41 = vpop.f32.mrb[24].mxu0  ;;  %v2003_v44 = vpop.f32.mrb[24].mxu1 }
 0x17e   : > { %v1300_v47 = vadd.f32 %v1971_v41, %v2603_v40  ;;  %v913_v50 = vpop.f32.mrb[25].mxu0  ;;  %v2777_v52 = vadd.f32 %v2003_v44, %v2603_v40  ;;  %v1041_v54 = vpop.f32.mrb[25].mxu1 }
 0x17f   : > { %v1557_v55 = vadd.f32 %v1556_v39, %v1494_v36  ;;  %v1298_v57 = vadd.f32 %v2603_v40, %v913_v50  ;;  %v1424_v59 = vadd.f32 %v1423_v37, %v1297_v22  ;;  %v1972_v60 = vpop.f32.mrb[26].mxu0  ;;  %v2781_v61 = vadd.f32 %v2603_v40, %v1041_v54  ;;  %v2004_v62 = vpop.f32.mrb[26].mxu1 }
 0x180   : > { %1364 = vst [vmem:[%s2613_s17 + $0xd0] sm:$0xff] %v1300_v47  ;;  %v1301_v63 = vadd.f32 %v1972_v60, %v2603_v40  ;;  %v916_v0 = vpop.f32.mrb[27].mxu0  ;;  %1396 = vst [vmem:[%s2613_s17 + $0x1d0] sm:$0xff] %v2777_v52  ;;  %v2788_v2 = vadd.f32 %v2004_v62, %v2603_v40  ;;  %v1044_v3 = vpop.f32.mrb[27].mxu1  ;;  %v1498_v19 = vmul.f32 %v1300_v47, %v1300_v47 }
 0x181   : > { %1362 = vst [vmem:[%s2613_s17 + $0xc0] sm:$0xff] %v1298_v57  ;;  %v1425_v5 = vadd.f32 %v1424_v59, %v1298_v57  ;;  %v1496_v6 = vmul.f32 %v1298_v57, %v1298_v57  ;;  %v1558_v7 = vadd.f32 %v1557_v55, %v1495_v46  ;;  %v1299_v11 = vadd.f32 %v2603_v40, %v916_v0 }
 0x182   : > { %1394 = vst [vmem:[%s2613_s17 + $0x1c0] sm:$0xff] %v2781_v61  ;;  %1365 = vst [vmem:[%s2613_s17 + $0xd8] sm:$0xff] %v1301_v63  ;;  %v2798_v12 = vadd.f32 %v2603_v40, %v1044_v3  ;;  %v1499_v27 = vmul.f32 %v1301_v63, %v1301_v63 }
 0x183   : > { %1397 = vst [vmem:[%s2613_s17 + $0x1d8] sm:$0xff] %v2788_v2  ;;  %v1559_v15 = vadd.f32 %v1558_v7, %v1496_v6  ;;  %1363 = vst [vmem:[%s2613_s17 + $0xc8] sm:$0xff] %v1299_v11  ;;  %v1426_v16 = vadd.f32 %v1425_v5, %v1299_v11  ;;  %v1497_v17 = vmul.f32 %v1299_v11, %v1299_v11 }
 0x184   : > { %1395 = vst [vmem:[%s2613_s17 + $0x1c8] sm:$0xff] %v2798_v12 }
 0x185   : > { %v1427_v22 = vadd.f32 %v1426_v16, %v1300_v47  ;;  %v1560_v23 = vadd.f32 %v1559_v15, %v1497_v17  ;;  %v1975_v25 = vpop.f32.mrb[28].mxu0  ;;  %v2007_v26 = vpop.f32.mrb[28].mxu1 }
 0x186   : > { %v1304_v28 = vadd.f32 %v1975_v25, %v2603_v40  ;;  %v929_v29 = vpop.f32.mrb[29].mxu0  ;;  %v2805_v31 = vadd.f32 %v2007_v26, %v2603_v40  ;;  %v1057_v33 = vpop.f32.mrb[29].mxu1 }
 0x187   : > { %v1561_v35 = vadd.f32 %v1560_v23, %v1498_v19  ;;  %v1302_v36 = vadd.f32 %v2603_v40, %v929_v29  ;;  %v1428_v37 = vadd.f32 %v1427_v22, %v1301_v63  ;;  %v1976_v39 = vpop.f32.mrb[30].mxu0  ;;  %v2811_v41 = vadd.f32 %v2603_v40, %v1057_v33  ;;  %v2008_v44 = vpop.f32.mrb[30].mxu1 }
 0x188   : > { %1368 = vst [vmem:[%s2613_s17 + $0xf0] sm:$0xff] %v1304_v28  ;;  %v1305_v46 = vadd.f32 %v1976_v39, %v2603_v40  ;;  %v932_v47 = vpop.f32.mrb[31].mxu0  ;;  %1400 = vst [vmem:[%s2613_s17 + $0x1f0] sm:$0xff] %v2805_v31  ;;  %v2818_v50 = vadd.f32 %v2008_v44, %v2603_v40  ;;  %v1060_v54 = vpop.f32.mrb[31].mxu1  ;;  %v1502_v5 = vmul.f32 %v1304_v28, %v1304_v28 }
 0x189   : > { %1366 = vst [vmem:[%s2613_s17 + $0xe0] sm:$0xff] %v1302_v36  ;;  %v1429_v55 = vadd.f32 %v1428_v37, %v1302_v36  ;;  %v1500_v57 = vmul.f32 %v1302_v36, %v1302_v36  ;;  %v1562_v59 = vadd.f32 %v1561_v35, %v1499_v27  ;;  %v1303_v60 = vadd.f32 %v2603_v40, %v932_v47 }
 0x18a   : > { %1398 = vst [vmem:[%s2613_s17 + $0x1e0] sm:$0xff] %v2811_v41  ;;  %1369 = vst [vmem:[%s2613_s17 + $0xf8] sm:$0xff] %v1305_v46  ;;  %v2835_v62 = vadd.f32 %v2603_v40, %v1060_v54 }
 0x18b   : > { %1401 = vst [vmem:[%s2613_s17 + $0x1f8] sm:$0xff] %v2818_v50  ;;  %v1563_v63 = vadd.f32 %v1562_v59, %v1500_v57  ;;  %1367 = vst [vmem:[%s2613_s17 + $0xe8] sm:$0xff] %v1303_v60  ;;  %v1430_v0 = vadd.f32 %v1429_v55, %v1303_v60  ;;  %v1501_v3 = vmul.f32 %v1303_v60, %v1303_v60 }
 0x18c   : > { %1399 = vst [vmem:[%s2613_s17 + $0x1e8] sm:$0xff] %v2835_v62 }
 0x18d   : > { %v1431_v6 = vadd.f32 %v1430_v0, %v1304_v28  ;;  %v1564_v7 = vadd.f32 %v1563_v63, %v1501_v3 }
 0x18e   : > { %2223 = shalt.err (!%p2220_p9)
}
 0x18f   : > { %s2224_s28 = scalar_lea.hbm %s2827_s14, 8192  ;;  %s2228_s8 = scalar_lea.hbm %s3056_s3, 16384 }
 0x190   : > { %p2225_p1 = scmp.ne.s32.totalorder %s2827_s14, %s2224_s28  ;;  %p2229_p7 = scmp.lt.u32.totalorder %s2827_s14, %s3056_s3 }
 0x191   : > { %p2230_p13 = scmp.lt.u32.totalorder %s2228_s8, %s2224_s28  ;;  %p2232_p6 = scmp.lt.u32.totalorder %s2224_s28, %s2827_s14 }
 0x192   : > { %p2226_p2 = pnand %p2225_p1, %p2494_p10 }
 0x193   : > { %p2231_p4 = por %p2230_p13, %p2229_p7 }
 0x194   : > { %p2227_p3 = pneg %p2226_p2 }
 0x195   : > { %p2233_p8 = por %p2232_p6, %p2231_p4 }
 0x197   : > { %p2234_p12 = pnand %p2233_p8, %p2227_p3 }
 0x199   : > { %2237 = shalt.err (!%p2234_p12)
}
 0x19a   : > { %s2363_s29 = smov 128   ;;  %s2364_s30 = smov 8   ;;  %v1503_v40 = vmul.f32 %v1305_v46, %v1305_v46  ;;  %v1565_v11 = vadd.f32 %v1564_v7, %v1502_v5  ;;  %v1432_v15 = vadd.f32 %v1431_v6, %v1305_v46  ;;  %v1504_v16 = vmul.f32 %v2611_v49, %v2611_v49 }
 0x19b   : > { %2031 = dma.vmem_to_hbm [thread:$0]  (%p2494_p10), %s2829_s11, 8192, %s2827_s14, %s1607_s15, %s2363_s29, %s2363_s29, %s2364_s30   ;;  %v1505_v25 = vmul.f32 %v2627_v56, %v2627_v56  ;;  %v1506_v26 = vmul.f32 %v2607_v45, %v2607_v45  ;;  %v1507_v29 = vmul.f32 %v2620_v53, %v2620_v53  ;;  %v1509_v44 = vmul.f32 %v2658_v20, %v2658_v20 }
 0x19c   : > { %v1433_v17 = vadd.f32 %v1432_v15, %v2611_v49  ;;  %v1566_v19 = vadd.f32 %v1565_v11, %v1503_v40  ;;  %v1508_v49 = vmul.f32 %v2641_v10, %v2641_v10  ;;  %v1513_v63 = vmul.f32 %v2686_v51, %v2686_v51  ;;  %s1611_s11 = sand.u32 1, %s2428_s24   ;;  %s1883_s14 = sshll.u32 %s2348_s21, 4 }
 0x19d   : > { %v1517_v15 = vmul.f32 %v2714_v21, %v2714_v21  ;;  %s317_s15 = scalar_lea.vmem [#allocation9], %s2553_s10  ;;  %s323_s26 = scalar_lea.vmem [#allocation11], %s2553_s10 }
 0x19e   : > { %v1567_v22 = vadd.f32 %v1566_v19, %v1504_v16  ;;  %v1434_v23 = vadd.f32 %v1433_v17, %v2627_v56  ;;  %s1646_s25 = sshll.u32 %s317_s15, 4  ;;  %s1660_s28 = sshll.u32 %s323_s26, 4  ;;  %s2971_s25 = int_to_ptr.vmem [resolvable:$true] %s1646_s25  ;;  %s2978_s28 = int_to_ptr.vmem [resolvable:$true] %s1660_s28 }
 0x19f   : > { %s2969_s8 = scalar_lea.hbm %s3057_s4, %s1883_s14  ;;  %s2976_s9 = scalar_lea.hbm %s3058_s5, %s1883_s14 }
 0x1a0   : > { %v1435_v27 = vadd.f32 %v1434_v23, %v2607_v45  ;;  %v1568_v28 = vadd.f32 %v1567_v22, %v1505_v25  ;;  %v1510_v45 = vmul.f32 %v2637_v4, %v2637_v4  ;;  %s2980_s12 = scalar_lea.sflag [#allocation10], %s1611_s11  ;;  %s2238_s29 = scalar_lea.vmem %s2971_s25, 16 }
 0x1a1   : > { %p2239_p11 = scmp.ne.s32.totalorder %s2971_s25, %s2238_s29  ;;  %s2365_s30 = smov [#allocation9]  }
 0x1a2   : > { %v1569_v33 = vadd.f32 %v1568_v28, %v1506_v26  ;;  %v1436_v35 = vadd.f32 %v1435_v27, %v2620_v53  ;;  %v1511_v53 = vmul.f32 %v2648_v14, %v2648_v14  ;;  %v1521_v27 = vmul.f32 %v2742_v58, %v2742_v58  ;;  %s2242_s16 = sshll.u32 %s2365_s30, 4  ;;  %s2243_s16 = int_to_ptr.vmem [resolvable:$false] %s2242_s16 }
 0x1a3   : > { %p2240_p0 = pnand %p2239_p11, %p2494_p10  ;;  %s2244_s17 = scalar_lea.vmem %s2243_s16, 32 }
 0x1a4   : > { %v1437_v36 = vadd.f32 %v1436_v35, %v2641_v10  ;;  %v1570_v37 = vadd.f32 %v1569_v33, %v1507_v29  ;;  %v1512_v10 = vmul.f32 %v2669_v38, %v2669_v38  ;;  %p2245_p9 = scmp.lt.s32.totalorder %s2971_s25, %s2243_s16  ;;  %p2246_p1 = scmp.lt.s32.totalorder %s2244_s17, %s2238_s29 }
 0x1a5   : > { %p2241_p5 = pneg %p2240_p0 }
 0x1a6   : > { %v1571_v39 = vadd.f32 %v1570_v37, %v1508_v49  ;;  %v1438_v56 = vadd.f32 %v1437_v36, %v2658_v20  ;;  %p2247_p2 = por %p2246_p1, %p2245_p9 }
 0x1a8   : > { %v1439_v46 = vadd.f32 %v1438_v56, %v2637_v4  ;;  %v1572_v47 = vadd.f32 %v1571_v39, %v1509_v44  ;;  %v1514_v4 = vmul.f32 %v2665_v32, %v2665_v32  ;;  %v1525_v39 = vmul.f32 %v2770_v30, %v2770_v30  ;;  %p2248_p3 = pnand %p2247_p2, %p2241_p5 }
 0x1aa   : > { %v1573_v54 = vadd.f32 %v1572_v47, %v1510_v45  ;;  %v1440_v55 = vadd.f32 %v1439_v46, %v2648_v14  ;;  %v1515_v14 = vmul.f32 %v2676_v43, %v2676_v43 }
 0x1ac   : > { %v1441_v57 = vadd.f32 %v1440_v55, %v2669_v38  ;;  %v1574_v59 = vadd.f32 %v1573_v54, %v1511_v53  ;;  %v1516_v38 = vmul.f32 %v2697_v8, %v2697_v8  ;;  %v1529_v55 = vmul.f32 %v2798_v12, %v2798_v12 }
 0x1ae   : > { %v1575_v60 = vadd.f32 %v1574_v59, %v1512_v10  ;;  %v1442_v20 = vadd.f32 %v1441_v57, %v2686_v51 }
 0x1b0   : > { %v1443_v0 = vadd.f32 %v1442_v20, %v2665_v32  ;;  %v1576_v3 = vadd.f32 %v1575_v60, %v1513_v63  ;;  %v1518_v32 = vmul.f32 %v2693_v1, %v2693_v1 }
 0x1b2   : > { %v1577_v5 = vadd.f32 %v1576_v3, %v1514_v4  ;;  %v1444_v6 = vadd.f32 %v1443_v0, %v2676_v43  ;;  %v1519_v43 = vmul.f32 %v2704_v13, %v2704_v13  ;;  %v1534_v0 = vmul.f32 %v2805_v31, %v2805_v31 }
 0x1b4   : > { %v1445_v7 = vadd.f32 %v1444_v6, %v2697_v8  ;;  %v1578_v40 = vadd.f32 %v1577_v5, %v1515_v14  ;;  %v1520_v8 = vmul.f32 %v2725_v42, %v2725_v42  ;;  %v1535_v14 = vmul.f32 %v2818_v50, %v2818_v50 }
 0x1b6   : > { %v1579_v11 = vadd.f32 %v1578_v40, %v1516_v38  ;;  %v1446_v51 = vadd.f32 %v1445_v7, %v2714_v21 }
 0x1b8   : > { %v1447_v16 = vadd.f32 %v1446_v51, %v2693_v1  ;;  %v1580_v17 = vadd.f32 %v1579_v11, %v1517_v15  ;;  %v1522_v1 = vmul.f32 %v2721_v34, %v2721_v34 }
 0x1ba   : > { %v1581_v19 = vadd.f32 %v1580_v17, %v1518_v32  ;;  %v1448_v22 = vadd.f32 %v1447_v16, %v2704_v13  ;;  %v1523_v13 = vmul.f32 %v2732_v48, %v2732_v48 }
 0x1bc   : > { %v1449_v23 = vadd.f32 %v1448_v22, %v2725_v42  ;;  %v1582_v25 = vadd.f32 %v1581_v19, %v1519_v43  ;;  %v1524_v42 = vmul.f32 %v2753_v18, %v2753_v18 }
 0x1be   : > { %v1583_v26 = vadd.f32 %v1582_v25, %v1520_v8  ;;  %v1450_v21 = vadd.f32 %v1449_v23, %v2742_v58 }
 0x1c0   : > { %v1451_v28 = vadd.f32 %v1450_v21, %v2721_v34  ;;  %v1584_v29 = vadd.f32 %v1583_v26, %v1521_v27  ;;  %v1526_v34 = vmul.f32 %v2749_v9, %v2749_v9 }
 0x1c2   : > { %v1585_v33 = vadd.f32 %v1584_v29, %v1522_v1  ;;  %v1452_v35 = vadd.f32 %v1451_v28, %v2732_v48  ;;  %v1527_v48 = vmul.f32 %v2760_v24, %v2760_v24 }
 0x1c4   : > { %v1453_v49 = vadd.f32 %v1452_v35, %v2753_v18  ;;  %v1586_v36 = vadd.f32 %v1585_v33, %v1523_v13  ;;  %v1528_v18 = vmul.f32 %v2781_v61, %v2781_v61 }
 0x1c6   : > { %v1587_v37 = vadd.f32 %v1586_v36, %v1524_v42  ;;  %v1454_v58 = vadd.f32 %v1453_v49, %v2770_v30 }
 0x1c8   : > { %v1455_v56 = vadd.f32 %v1454_v58, %v2749_v9  ;;  %v1588_v44 = vadd.f32 %v1587_v37, %v1525_v39  ;;  %v1530_v9 = vmul.f32 %v2777_v52, %v2777_v52 }
 0x1ca   : > { %v1589_v45 = vadd.f32 %v1588_v44, %v1526_v34  ;;  %v1456_v46 = vadd.f32 %v1455_v56, %v2760_v24  ;;  %v1531_v24 = vmul.f32 %v2788_v2, %v2788_v2 }
 0x1cc   : > { %v1457_v47 = vadd.f32 %v1456_v46, %v2781_v61  ;;  %v1590_v53 = vadd.f32 %v1589_v45, %v1527_v48  ;;  %v1532_v61 = vmul.f32 %v2811_v41, %v2811_v41 }
 0x1ce   : > { %v1591_v54 = vadd.f32 %v1590_v53, %v1528_v18  ;;  %v1458_v30 = vadd.f32 %v1457_v47, %v2798_v12 }
 0x1d0   : > { %v1459_v10 = vadd.f32 %v1458_v30, %v2777_v52  ;;  %v1592_v57 = vadd.f32 %v1591_v54, %v1529_v55  ;;  %v1533_v52 = vmul.f32 %v2835_v62, %v2835_v62 }
 0x1d2   : > { %v1593_v59 = vadd.f32 %v1592_v57, %v1530_v9  ;;  %v1460_v60 = vadd.f32 %v1459_v10, %v2788_v2 }
 0x1d4   : > { %v1461_v20 = vadd.f32 %v1460_v60, %v2811_v41  ;;  %v1594_v63 = vadd.f32 %v1593_v59, %v1531_v24 }
 0x1d6   : > { %v1595_v4 = vadd.f32 %v1594_v63, %v1532_v61  ;;  %v1462_v12 = vadd.f32 %v1461_v20, %v2835_v62 }
 0x1d8   : > { %v1463_v2 = vadd.f32 %v1462_v12, %v2805_v31  ;;  %v1596_v3 = vadd.f32 %v1595_v4, %v1533_v52 }
 0x1da   : > { %v1464_v41 = vadd.f32 %v1463_v2, %v2818_v50  ;;  %v1597_v5 = vadd.f32 %v1596_v3, %v1534_v0 }
 0x1dc   : > { %v1465_v6 = vrot.slane %v1464_v41, 4  ;;  %v1598_v38 = vadd.f32 %v1597_v5, %v1535_v14 }
 0x1de   : > { %v1466_v7 = vadd.f32 %v1465_v6, %v1464_v41  ;;  %v1599_v62 = vrot.slane %v1598_v38, 4 }
 0x1e0   : > { %v1467_v40 = vrot.slane %v1466_v7, 2  ;;  %v1600_v11 = vadd.f32 %v1599_v62, %v1598_v38 }
 0x1e2   : > { %v1601_v51 = vrot.slane %v1600_v11, 2  ;;  %v1468_v15 = vadd.f32 %v1467_v40, %v1466_v7 }
 0x1e4   : > { %v1469_v31 = vrot.slane %v1468_v15, 1  ;;  %v1602_v32 = vadd.f32 %v1601_v51, %v1600_v11 }
 0x1e6   : > { %v1470_v50 = vadd.f32 %v1469_v31, %v1468_v15  ;;  %v1603_v16 = vrot.slane %v1602_v32, 1 }
 0x1e8   : > { %1471 = vst [vmem:[%s317_s15] sm:$0x1] %v1470_v50  ;;  %v1604_v17 = vadd.f32 %v1603_v16, %v1602_v32 }
 0x1e9   : > { %2251 = shalt.err (!%p2248_p3)
}
 0x1ea   : > { %s2252_s11 = scalar_lea.hbm %s2969_s8, 16  ;;  %s2256_s21 = scalar_lea.hbm %s3057_s4, 32 }
 0x1eb   : > { %p2253_p7 = scmp.ne.s32.totalorder %s2969_s8, %s2252_s11  ;;  %p2257_p6 = scmp.lt.u32.totalorder %s2969_s8, %s3057_s4 }
 0x1ec   : > { %p2258_p8 = scmp.lt.u32.totalorder %s2256_s21, %s2252_s11  ;;  %p2260_p11 = scmp.lt.u32.totalorder %s2252_s11, %s2969_s8 }
 0x1ed   : > { %p2254_p13 = pnand %p2253_p7, %p2494_p10 }
 0x1ee   : > { %p2259_p12 = por %p2258_p8, %p2257_p6 }
 0x1ef   : > { %p2255_p4 = pneg %p2254_p13 }
 0x1f0   : > { %p2261_p0 = por %p2260_p11, %p2259_p12 }
 0x1f2   : > { %p2262_p5 = pnand %p2261_p0, %p2255_p4 }
 0x1f4   : > { %2265 = shalt.err (!%p2262_p5)
}
 0x1f5   : > { %2032 = dma.vmem_to_hbm [thread:$0]  (%p2494_p10), %s2971_s25, 16, %s2969_s8, %s2980_s12   ;;  %1605 = vst [vmem:[%s323_s26] sm:$0x1] %v1604_v17 }
 0x1f6   : > { %s2266_s29 = scalar_lea.vmem %s2978_s28, 16  ;;  %s2366_s16 = smov [#allocation11]  }
 0x1f7   : > { %p2267_p9 = scmp.ne.s32.totalorder %s2978_s28, %s2266_s29  ;;  %s2270_s17 = sshll.u32 %s2366_s16, 4  ;;  %s2271_s17 = int_to_ptr.vmem [resolvable:$false] %s2270_s17 }
 0x1f8   : > { %s2272_s11 = scalar_lea.vmem %s2271_s17, 32  ;;  %p2273_p3 = scmp.lt.s32.totalorder %s2978_s28, %s2271_s17 }
 0x1f9   : > { %p2268_p1 = pnand %p2267_p9, %p2494_p10  ;;  %p2274_p7 = scmp.lt.s32.totalorder %s2272_s11, %s2266_s29 }
 0x1fb   : > { %p2269_p2 = pneg %p2268_p1  ;;  %p2275_p13 = por %p2274_p7, %p2273_p3 }
 0x1fd   : > { %p2276_p4 = pnand %p2275_p13, %p2269_p2 }
 0x1ff   : > { %2279 = shalt.err (!%p2276_p4)
}
 0x200   : > { %s2280_s10 = scalar_lea.hbm %s2976_s9, 16  ;;  %s2284_s8 = scalar_lea.hbm %s3058_s5, 32 }
 0x201   : > { %p2281_p6 = scmp.ne.s32.totalorder %s2976_s9, %s2280_s10  ;;  %p2285_p11 = scmp.lt.u32.totalorder %s2976_s9, %s3058_s5 }
 0x202   : > { %p2286_p0 = scmp.lt.u32.totalorder %s2284_s8, %s2280_s10  ;;  %p2288_p9 = scmp.lt.u32.totalorder %s2280_s10, %s2976_s9 }
 0x203   : > { %p2282_p8 = pnand %p2281_p6, %p2494_p10 }
 0x204   : > { %p2287_p5 = por %p2286_p0, %p2285_p11 }
 0x205   : > { %p2283_p12 = pneg %p2282_p8 }
 0x206   : > { %p2289_p1 = por %p2288_p9, %p2287_p5 }
 0x208   : > { %p2290_p2 = pnand %p2289_p1, %p2283_p12 }
 0x20a   : > { %2293 = shalt.err (!%p2290_p2)
}
 0x20b   : > { %2033 = dma.vmem_to_hbm [thread:$0]  (%p2494_p10), %s2978_s28, 16, %s2976_s9, %s2980_s12  }
 0x20c PF: > { %s1672_s21 = sand.u32 1, %s2336_s18   ;;  %p3077_p3 = scmp.ne.s32.totalorder %s3065_s27, 0 }
 0x20d   : > { %p3078_p7 = scmp.ge.s32.totalorder %s2356_s23, 2  ;;  %s1673_s24 = scalar_lea.sflag [#allocation5], %s1672_s21 }
 0x20f   : > { %p2046_p13 = pnand %p3078_p7, %p3077_p3 }
 0x211   : > { %2327 = dma.done.wait (!%p2046_p13), %s1673_s24, 8192  }
 0x212   : > { %2329 = vsyncadd (!%p2046_p13), %s1673_s24, 4294959104  ;;  %s3079_s30 = sadd.s32 4294967294, %s2356_s23  }
 0x213   : > { %s1681_s29 = sand.u32 1, %s3079_s30  }
 0x214   : > { %s1682_s16 = scalar_lea.sflag [#allocation10], %s1681_s29 }
 0x215   : > { %2331 = dma.done.wait (!%p2046_p13), %s1682_s16, 32  }
 0x216   : > { %2333 = vsyncadd (!%p2046_p13), %s1682_s16, 4294967264  ;;  %s26_s23 = sadd.s32 1, %s2356_s23   ;;  %s3080_s18 = smov %s2340_s19 }
 0x217   : > { %p23_p10 = scmp.ge.s32.totalorder %s26_s23, 4   ;;  %s3081_s19 = smov %s2344_s20 }
 0x218   : > { %s3082_s20 = smov %s2503_s13  ;;  %s3083_s21 = smov %s2352_s22 }
 0x219   : > { %s3084_s22 = smov %s3086_s7  ;;  %25 = sbr.rel (!%p23_p10) target bundleno = 9 (0x9), region = 125 }
 0x220   :  { %1694 = vsyncpa [#allocation4], 1 }
 0x221   :  { %1696 = vsyncpa [#allocation4 + $0x1], 1 }
 0x222   :  { %1697 = vsyncpa [#allocation7], 1 }
 0x223   :  { %1698 = vsyncpa [#allocation5], 1 }
 0x224   :  { %1700 = vsyncpa [#allocation5 + $0x1], 1 }
 0x225   :  { %1701 = vsyncpa [#allocation10], 1 }
 0x226   :  { %1703 = vsyncpa [#allocation10 + $0x1], 1 }

</bundles_post_ra>
